<compile_context>
chip_gen: v7x
topology: tpu7x:2x2x1
jax: 0.10.0
libtpu: 0.0.40
codegen_flags: <defaults>
</compile_context>

<pallas_src>
import functools

import jax
import jax.numpy as jnp
from jax.experimental import pallas as pl
from jax.experimental.pallas import tpu as pltpu

EPS = 1e-5


def _resblock_kernel(N, L1, C_in, C_out, K,
                     xt_ref, tm_ref,
                     w1_ref, g1_ref, be1_ref,
                     w2_ref, g2_ref, be2_ref,
                     wsc_ref, gsc_ref, besc_ref,
                     out_ref):
    """Whole residual block, VMEM-resident, 2D (C, N*L1) layout."""
    pad = K // 2
    nl = N * L1
    inv_cnt = 1.0 / float(nl)

    def bn(h, g_ref, b_ref):
        # Training-mode batch norm; two-pass centered variance (f32, safe
        # against cancellation), rsqrt goes to the EUP slot.
        m = jnp.sum(h, axis=1, keepdims=True) * inv_cnt
        hc = h - m
        v = jnp.sum(hc * hc, axis=1, keepdims=True) * inv_cnt
        return hc * (jax.lax.rsqrt(v + EPS) * g_ref[...]) + b_ref[...]

    xt = xt_ref[...]                                   # (K*C_in, N*L1)

    # ---- conv1: kernel K, stride 2 -- single MXU matmul (taps folded) ------
    h1 = jnp.dot(w1_ref[...], xt, preferred_element_type=jnp.float32)
    h1 = jnp.maximum(bn(h1, g1_ref, be1_ref), 0.0)     # relu(bn1), (C_out, N*L1)

    # ---- conv2: kernel K, stride 1, "same" padding --------------------------
    # K shifted views of h1 via XLU roll + boundary-mask multiply, stacked on
    # sublanes -> one matmul with contraction depth K*C_out.
    tm = tm_ref[...]                                   # (K, 1, N*L1) float masks
    taps = []
    for k in range(K):                                 # static unroll
        d = k - pad
        if d == 0:
            taps.append(h1)
        else:
            rolled = pltpu.roll(h1, (-d) % nl, axis=1)
            taps.append(rolled * tm[k])                # (1, N*L1) sublane bcast
    h1_taps = jnp.concatenate(taps, axis=0)            # (K*C_out, N*L1)
    out2 = jnp.dot(w2_ref[...], h1_taps, preferred_element_type=jnp.float32)
    out2 = bn(out2, g2_ref, be2_ref)                   # bn2

    # ---- shortcut: 1x1 conv stride 2 + bn (input = first C_in rows of xt) ---
    sc = jnp.dot(wsc_ref[...], xt[0:C_in, :], preferred_element_type=jnp.float32)
    sc = bn(sc, gsc_ref, besc_ref)

    # ---- residual add + final relu ------------------------------------------
    out_ref[...] = jnp.maximum(out2 + sc, 0.0)


def _vmem_limit_bytes():
    # Generation-aware scoped-VMEM limit (v5e/v6e: 128 MiB phys, v7x: 64 MiB).
    try:
        cap = int(pltpu.get_tpu_info().vmem_capacity_bytes)
    except Exception:
        return None
    if cap <= 0:
        return None
    return min((cap * 3) // 4, 96 * 1024 * 1024)


def residual_block(x, params, kernel_size=3):
    """x: (N, C_in, L) float32 (PyTorch NCL). Returns (N, C_out, L1) NCL."""
    N, C_in, L = x.shape
    K = kernel_size
    assert K % 2 == 1, "even kernel_size breaks conv1/shortcut length matching"
    pad = K // 2
    L1 = (L + 2 * pad - K) // 2 + 1          # == ceil(L / 2) for odd K
    C_out = params["w1"].shape[0]
    NL = N * L1

    # ---- wrapper-side layout work -------------------------------------------
    # Stride-2 im2col for conv1: K lane-dense slabs stacked on the contraction
    # axis. Taps reordered so tap k==pad (the shortcut's input) is rows [0:C_in].
    tap_order = [pad] + [k for k in range(K) if k != pad]
    xp = jnp.pad(x.astype(jnp.float32), ((0, 0), (0, 0), (pad, pad)))
    taps = [xp[:, :, k:k + 2 * L1 - 1:2] for k in tap_order]      # (N, C_in, L1) each
    x_taps = jnp.concatenate(taps, axis=1)                        # (N, K*C_in, L1)
    x_taps = x_taps.transpose(1, 0, 2).reshape(K * C_in, NL)      # (K*C_in, N*L1)

    # conv2 boundary masks: tap shift d = k - pad is valid iff 0 <= t+d < L1
    # within each batch segment of the flattened lane axis.
    t_in_seg = jnp.tile(jnp.arange(L1, dtype=jnp.int32), N)       # (N*L1,)
    tap_mask = jnp.stack(
        [((t_in_seg + (k - pad) >= 0) & (t_in_seg + (k - pad) < L1))
         .astype(jnp.float32) for k in range(K)],
        axis=0).reshape(K, 1, NL)

    # Weight packing: lane-dense 2D, column index = tap_block * C + channel.
    w1f = jnp.take(params["w1"].astype(jnp.float32),
                   jnp.array(tap_order), axis=2)                  # (C_out, C_in, K)
    w1f = w1f.transpose(0, 2, 1).reshape(C_out, K * C_in)
    w2f = params["w2"].astype(jnp.float32).transpose(0, 2, 1).reshape(C_out, K * C_out)
    wsc = params["wsc"][:, :, 0].astype(jnp.float32)              # (C_out, C_in)

    cvec = lambda v: v.reshape(-1, 1).astype(jnp.float32)         # (C_out, 1)
    args = (
        x_taps, tap_mask,
        w1f, cvec(params["g1"]), cvec(params["be1"]),
        w2f, cvec(params["g2"]), cvec(params["be2"]),
        wsc, cvec(params["gsc"]), cvec(params["besc"]),
        # conv biases b1/b2/bsc intentionally omitted: no-ops before train-BN
    )

    vmem = pl.BlockSpec(memory_space=pltpu.MemorySpace.VMEM)
    kern = functools.partial(_resblock_kernel, N, L1, C_in, C_out, K)
    limit = _vmem_limit_bytes()
    cparams = pltpu.CompilerParams(vmem_limit_bytes=limit) if limit else None

    out2d = pl.pallas_call(
        kern,
        out_shape=jax.ShapeDtypeStruct((C_out, NL), jnp.float32),
        in_specs=[vmem] * len(args),
        out_specs=vmem,
        compiler_params=cparams,
    )(*args)

    # (C_out, N*L1) -> (N, C_out, L1)
    return out2d.reshape(C_out, N, L1).transpose(1, 0, 2)


# ---------------------------- pure-JAX reference ---------------------------
def _reference(x, params, kernel_size=3):
    K = kernel_size
    pad = K // 2

    def conv1d(h, w, b, stride, p):
        y = jax.lax.conv_general_dilated(h, w, (stride,), [(p, p)],
                                         dimension_numbers=("NCH", "OIH", "NCH"))
        return y + b[None, :, None]

    def bn(h, g, b):
        m = jnp.mean(h, axis=(0, 2), keepdims=True)
        v = jnp.var(h, axis=(0, 2), keepdims=True)   # biased (training mode)
        return (h - m) / jnp.sqrt(v + EPS) * g[None, :, None] + b[None, :, None]

    out = jax.nn.relu(bn(conv1d(x, params["w1"], params["b1"], 2, pad),
                         params["g1"], params["be1"]))
    out = bn(conv1d(out, params["w2"], params["b2"], 1, pad),
             params["g2"], params["be2"])
    sc = bn(conv1d(x, params["wsc"], params["bsc"], 2, 0),
            params["gsc"], params["besc"])
    return jax.nn.relu(out + sc)


if __name__ == "__main__":
    C_in, C_out, K = 4, 8, 3
    N, L = 2, 16

    ks = jax.random.split(jax.random.PRNGKey(0), 13)
    params = {
        "w1":  0.3 * jax.random.normal(ks[0], (C_out, C_in, K), jnp.float32),
        "b1":  0.1 * jax.random.normal(ks[1], (C_out,), jnp.float32),
        "g1":  1.0 + 0.1 * jax.random.normal(ks[2], (C_out,), jnp.float32),
        "be1": 0.1 * jax.random.normal(ks[3], (C_out,), jnp.float32),
        "w2":  0.3 * jax.random.normal(ks[4], (C_out, C_out, K), jnp.float32),
        "b2":  0.1 * jax.random.normal(ks[5], (C_out,), jnp.float32),
        "g2":  1.0 + 0.1 * jax.random.normal(ks[6], (C_out,), jnp.float32),
        "be2": 0.1 * jax.random.normal(ks[7], (C_out,), jnp.float32),
        "wsc": 0.3 * jax.random.normal(ks[8], (C_out, C_in, 1), jnp.float32),
        "bsc": 0.1 * jax.random.normal(ks[9], (C_out,), jnp.float32),
        "gsc": 1.0 + 0.1 * jax.random.normal(ks[10], (C_out,), jnp.float32),
        "besc": 0.1 * jax.random.normal(ks[11], (C_out,), jnp.float32),
    }
    x = jax.random.normal(ks[12], (N, C_in, L), jnp.float32)

    out = jax.block_until_ready(residual_block(x, params, kernel_size=K))
    ref = jax.block_until_ready(_reference(x, params, kernel_size=K))

    L1 = (L + 2 * (K // 2) - K) // 2 + 1
    assert out.shape == (N, C_out, L1), out.shape
    if not jnp.allclose(out, ref, atol=1e-4, rtol=1e-3):
        raise AssertionError(
            f"mismatch: max abs err = {float(jnp.max(jnp.abs(out - ref)))}")
    print("KERNEL_OK")
</pallas_src>

<mosaic_0001>
module attributes {stable_mosaic.version = 11 : i64} {
  func.func @_resblock_kernel(%arg0: memref<12x16xf32, #tpu.memory_space<vmem>>, %arg1: memref<3x1x16xf32, #tpu.memory_space<vmem>>, %arg2: memref<8x12xf32, #tpu.memory_space<vmem>>, %arg3: memref<8x1xf32, #tpu.memory_space<vmem>>, %arg4: memref<8x1xf32, #tpu.memory_space<vmem>>, %arg5: memref<8x24xf32, #tpu.memory_space<vmem>>, %arg6: memref<8x1xf32, #tpu.memory_space<vmem>>, %arg7: memref<8x1xf32, #tpu.memory_space<vmem>>, %arg8: memref<8x4xf32, #tpu.memory_space<vmem>>, %arg9: memref<8x1xf32, #tpu.memory_space<vmem>>, %arg10: memref<8x1xf32, #tpu.memory_space<vmem>>, %arg11: memref<8x16xf32, #tpu.memory_space<vmem>>) attributes {dimension_semantics = [], scalar_prefetch = 0 : i64, scratch_operands = 0 : i64, tpu.core_type = #tpu.core_type<tc>} {
    %c0 = arith.constant 0 : index
    %c0_0 = arith.constant 0 : index
    %0 = vector.load %arg0[%c0, %c0_0] : memref<12x16xf32, #tpu.memory_space<vmem>>, vector<12x16xf32>
    %c0_1 = arith.constant 0 : index
    %c0_2 = arith.constant 0 : index
    %1 = vector.load %arg2[%c0_1, %c0_2] : memref<8x12xf32, #tpu.memory_space<vmem>>, vector<8x12xf32>
    %cst = arith.constant dense<0.000000e+00> : vector<8x16xf32>
    %2 = tpu.matmul %1, %0, %cst {dimension_numbers = #tpu.dot_dimension_numbers<[1], [0], [0], [1], [0, 0, 1, 1], [], []>} : vector<8x12xf32>, vector<12x16xf32>, vector<8x16xf32> -> vector<8x16xf32>
    %cst_3 = arith.constant dense<0.000000e+00> : vector<8xf32>
    %3 = vector.multi_reduction <add>, %2, %cst_3 [1] : vector<8x16xf32> to vector<8xf32>
    %4 = vector.shape_cast %3 : vector<8xf32> to vector<8x1xf32>
    %cst_4 = arith.constant 6.250000e-02 : f32
    %5 = vector.broadcast %cst_4 : f32 to vector<8x1xf32>
    %6 = arith.mulf %4, %5 : vector<8x1xf32>
    %7 = vector.broadcast %6 : vector<8x1xf32> to vector<8x16xf32>
    %8 = arith.subf %2, %7 : vector<8x16xf32>
    %9 = arith.mulf %8, %8 : vector<8x16xf32>
    %cst_5 = arith.constant dense<0.000000e+00> : vector<8xf32>
    %10 = vector.multi_reduction <add>, %9, %cst_5 [1] : vector<8x16xf32> to vector<8xf32>
    %11 = vector.shape_cast %10 : vector<8xf32> to vector<8x1xf32>
    %cst_6 = arith.constant 6.250000e-02 : f32
    %12 = vector.broadcast %cst_6 : f32 to vector<8x1xf32>
    %13 = arith.mulf %11, %12 : vector<8x1xf32>
    %cst_7 = arith.constant 9.99999974E-6 : f32
    %14 = vector.broadcast %cst_7 : f32 to vector<8x1xf32>
    %15 = arith.addf %13, %14 : vector<8x1xf32>
    %16 = math.rsqrt %15 : vector<8x1xf32>
    %c0_8 = arith.constant 0 : index
    %c0_9 = arith.constant 0 : index
    %17 = vector.load %arg3[%c0_8, %c0_9] : memref<8x1xf32, #tpu.memory_space<vmem>>, vector<8x1xf32>
    %18 = arith.mulf %16, %17 : vector<8x1xf32>
    %19 = vector.broadcast %18 : vector<8x1xf32> to vector<8x16xf32>
    %20 = arith.mulf %8, %19 : vector<8x16xf32>
    %c0_10 = arith.constant 0 : index
    %c0_11 = arith.constant 0 : index
    %21 = vector.load %arg4[%c0_10, %c0_11] : memref<8x1xf32, #tpu.memory_space<vmem>>, vector<8x1xf32>
    %22 = vector.broadcast %21 : vector<8x1xf32> to vector<8x16xf32>
    %23 = arith.addf %20, %22 : vector<8x16xf32>
    %cst_12 = arith.constant 0.000000e+00 : f32
    %24 = vector.broadcast %cst_12 : f32 to vector<8x16xf32>
    %25 = arith.maximumf %23, %24 : vector<8x16xf32>
    %c0_13 = arith.constant 0 : index
    %c0_14 = arith.constant 0 : index
    %c0_15 = arith.constant 0 : index
    %26 = vector.load %arg1[%c0_13, %c0_14, %c0_15] : memref<3x1x16xf32, #tpu.memory_space<vmem>>, vector<3x1x16xf32>
    %c1_i32 = arith.constant 1 : i32
    %27 = tpu.dynamic_rotate %25 by %c1_i32 dim 1 : vector<8x16xf32>, i32 -> vector<8x16xf32>
    %28 = vector.extract_strided_slice %26 {offsets = [0, 0, 0], sizes = [1, 1, 16], strides = [1, 1, 1]} : vector<3x1x16xf32> to vector<1x1x16xf32>
    %29 = vector.shape_cast %28 : vector<1x1x16xf32> to vector<1x16xf32>
    %30 = vector.broadcast %29 : vector<1x16xf32> to vector<8x16xf32>
    %31 = arith.mulf %27, %30 : vector<8x16xf32>
    %c15_i32 = arith.constant 15 : i32
    %32 = tpu.dynamic_rotate %25 by %c15_i32 dim 1 : vector<8x16xf32>, i32 -> vector<8x16xf32>
    %33 = vector.extract_strided_slice %26 {offsets = [2, 0, 0], sizes = [1, 1, 16], strides = [1, 1, 1]} : vector<3x1x16xf32> to vector<1x1x16xf32>
    %34 = vector.shape_cast %33 : vector<1x1x16xf32> to vector<1x16xf32>
    %35 = vector.broadcast %34 : vector<1x16xf32> to vector<8x16xf32>
    %36 = arith.mulf %32, %35 : vector<8x16xf32>
    %37 = tpu.concatenate %31, %25, %36 in 0 : vector<8x16xf32>, vector<8x16xf32>, vector<8x16xf32> -> vector<24x16xf32>
    %c0_16 = arith.constant 0 : index
    %c0_17 = arith.constant 0 : index
    %38 = vector.load %arg5[%c0_16, %c0_17] : memref<8x24xf32, #tpu.memory_space<vmem>>, vector<8x24xf32>
    %cst_18 = arith.constant dense<0.000000e+00> : vector<8x16xf32>
    %39 = tpu.matmul %38, %37, %cst_18 {dimension_numbers = #tpu.dot_dimension_numbers<[1], [0], [0], [1], [0, 0, 1, 1], [], []>} : vector<8x24xf32>, vector<24x16xf32>, vector<8x16xf32> -> vector<8x16xf32>
    %cst_19 = arith.constant dense<0.000000e+00> : vector<8xf32>
    %40 = vector.multi_reduction <add>, %39, %cst_19 [1] : vector<8x16xf32> to vector<8xf32>
    %41 = vector.shape_cast %40 : vector<8xf32> to vector<8x1xf32>
    %cst_20 = arith.constant 6.250000e-02 : f32
    %42 = vector.broadcast %cst_20 : f32 to vector<8x1xf32>
    %43 = arith.mulf %41, %42 : vector<8x1xf32>
    %44 = vector.broadcast %43 : vector<8x1xf32> to vector<8x16xf32>
    %45 = arith.subf %39, %44 : vector<8x16xf32>
    %46 = arith.mulf %45, %45 : vector<8x16xf32>
    %cst_21 = arith.constant dense<0.000000e+00> : vector<8xf32>
    %47 = vector.multi_reduction <add>, %46, %cst_21 [1] : vector<8x16xf32> to vector<8xf32>
    %48 = vector.shape_cast %47 : vector<8xf32> to vector<8x1xf32>
    %cst_22 = arith.constant 6.250000e-02 : f32
    %49 = vector.broadcast %cst_22 : f32 to vector<8x1xf32>
    %50 = arith.mulf %48, %49 : vector<8x1xf32>
    %cst_23 = arith.constant 9.99999974E-6 : f32
    %51 = vector.broadcast %cst_23 : f32 to vector<8x1xf32>
    %52 = arith.addf %50, %51 : vector<8x1xf32>
    %53 = math.rsqrt %52 : vector<8x1xf32>
    %c0_24 = arith.constant 0 : index
    %c0_25 = arith.constant 0 : index
    %54 = vector.load %arg6[%c0_24, %c0_25] : memref<8x1xf32, #tpu.memory_space<vmem>>, vector<8x1xf32>
    %55 = arith.mulf %53, %54 : vector<8x1xf32>
    %56 = vector.broadcast %55 : vector<8x1xf32> to vector<8x16xf32>
    %57 = arith.mulf %45, %56 : vector<8x16xf32>
    %c0_26 = arith.constant 0 : index
    %c0_27 = arith.constant 0 : index
    %58 = vector.load %arg7[%c0_26, %c0_27] : memref<8x1xf32, #tpu.memory_space<vmem>>, vector<8x1xf32>
    %59 = vector.broadcast %58 : vector<8x1xf32> to vector<8x16xf32>
    %60 = arith.addf %57, %59 : vector<8x16xf32>
    %c0_28 = arith.constant 0 : index
    %c0_29 = arith.constant 0 : index
    %61 = vector.load %arg8[%c0_28, %c0_29] : memref<8x4xf32, #tpu.memory_space<vmem>>, vector<8x4xf32>
    %62 = vector.extract_strided_slice %0 {offsets = [0, 0], sizes = [4, 16], strides = [1, 1]} : vector<12x16xf32> to vector<4x16xf32>
    %cst_30 = arith.constant dense<0.000000e+00> : vector<8x16xf32>
    %63 = tpu.matmul %61, %62, %cst_30 {dimension_numbers = #tpu.dot_dimension_numbers<[1], [0], [0], [1], [0, 0, 1, 1], [], []>} : vector<8x4xf32>, vector<4x16xf32>, vector<8x16xf32> -> vector<8x16xf32>
    %cst_31 = arith.constant dense<0.000000e+00> : vector<8xf32>
    %64 = vector.multi_reduction <add>, %63, %cst_31 [1] : vector<8x16xf32> to vector<8xf32>
    %65 = vector.shape_cast %64 : vector<8xf32> to vector<8x1xf32>
    %cst_32 = arith.constant 6.250000e-02 : f32
    %66 = vector.broadcast %cst_32 : f32 to vector<8x1xf32>
    %67 = arith.mulf %65, %66 : vector<8x1xf32>
    %68 = vector.broadcast %67 : vector<8x1xf32> to vector<8x16xf32>
    %69 = arith.subf %63, %68 : vector<8x16xf32>
    %70 = arith.mulf %69, %69 : vector<8x16xf32>
    %cst_33 = arith.constant dense<0.000000e+00> : vector<8xf32>
    %71 = vector.multi_reduction <add>, %70, %cst_33 [1] : vector<8x16xf32> to vector<8xf32>
    %72 = vector.shape_cast %71 : vector<8xf32> to vector<8x1xf32>
    %cst_34 = arith.constant 6.250000e-02 : f32
    %73 = vector.broadcast %cst_34 : f32 to vector<8x1xf32>
    %74 = arith.mulf %72, %73 : vector<8x1xf32>
    %cst_35 = arith.constant 9.99999974E-6 : f32
    %75 = vector.broadcast %cst_35 : f32 to vector<8x1xf32>
    %76 = arith.addf %74, %75 : vector<8x1xf32>
    %77 = math.rsqrt %76 : vector<8x1xf32>
    %c0_36 = arith.constant 0 : index
    %c0_37 = arith.constant 0 : index
    %78 = vector.load %arg9[%c0_36, %c0_37] : memref<8x1xf32, #tpu.memory_space<vmem>>, vector<8x1xf32>
    %79 = arith.mulf %77, %78 : vector<8x1xf32>
    %80 = vector.broadcast %79 : vector<8x1xf32> to vector<8x16xf32>
    %81 = arith.mulf %69, %80 : vector<8x16xf32>
    %c0_38 = arith.constant 0 : index
    %c0_39 = arith.constant 0 : index
    %82 = vector.load %arg10[%c0_38, %c0_39] : memref<8x1xf32, #tpu.memory_space<vmem>>, vector<8x1xf32>
    %83 = vector.broadcast %82 : vector<8x1xf32> to vector<8x16xf32>
    %84 = arith.addf %81, %83 : vector<8x16xf32>
    %85 = arith.addf %60, %84 : vector<8x16xf32>
    %cst_40 = arith.constant 0.000000e+00 : f32
    %86 = vector.broadcast %cst_40 : f32 to vector<8x16xf32>
    %87 = arith.maximumf %85, %86 : vector<8x16xf32>
    %c0_41 = arith.constant 0 : index
    %c0_42 = arith.constant 0 : index
    %88 = vector.load %arg11[%c0_41, %c0_42] : memref<8x16xf32, #tpu.memory_space<vmem>>, vector<8x16xf32>
    tpu.vector_store %arg11[%c0_41, %c0_42], %87 {strides = array<i32>} : memref<8x16xf32, #tpu.memory_space<vmem>>, vector<8x16xf32>,
    return
  }
}

</mosaic_0001>

<bundles_post_ra>
// kernel: tpu_custom_call.1
= control target key start
LH: loop header
LB: loop body
LE: loop exit
PB: predicated region body
PF: predicated region fallthrough
CT: control target
= control target key end

     0   :  { %vm46_vm0 = vcmask 1043456   ;;  %v508_v2 = vmov 0.0|0.0   ;;  %vm509_vm1 = vmmov 1   ;;  %vm510_vm3 = vmmov 0   ;;  %s644_s0 = inlined_call_operand.vmem [shape: f32[12,16], index: 0, kind: input, shape index: {}]   ;;  %s645_s1 = inlined_call_operand.vmem [shape: f32[3,1,16], index: 1, kind: input, shape index: {}]   ;;  %s646_s2 = inlined_call_operand.vmem [shape: f32[8,12], index: 2, kind: input, shape index: {}]   ;;  %s647_s3 = inlined_call_operand.vmem [shape: f32[8,1], index: 3, kind: input, shape index: {}]   ;;  %s648_s4 = inlined_call_operand.vmem [shape: f32[8,1], index: 4, kind: input, shape index: {}]   ;;  %s649_s5 = inlined_call_operand.vmem [shape: f32[8,24], index: 5, kind: input, shape index: {}]   ;;  %s650_s6 = inlined_call_operand.vmem [shape: f32[8,1], index: 6, kind: input, shape index: {}]   ;;  %s651_s7 = inlined_call_operand.vmem [shape: f32[8,1], index: 7, kind: input, shape index: {}]   ;;  %s652_s8 = inlined_call_operand.vmem [shape: f32[8,4], index: 8, kind: input, shape index: {}]   ;;  %s653_s9 = inlined_call_operand.vmem [shape: f32[8,1], index: 9, kind: input, shape index: {}]   ;;  %s654_s10 = inlined_call_operand.vmem [shape: f32[8,1], index: 10, kind: input, shape index: {}]   ;;  %s655_s11 = inlined_call_operand.hbm [shape: f32[8,16], index: 11, kind: output, shape index: {}]  }
   0x1   :  { %v39_v0 = vld [vmem:[%s644_s0] sm:$0xff]  ;;  %v40_v1 = vld [vmem:[%s644_s0 + $0x8] sm:$0xf]  ;;  %453 = vmatprep.subr.bf16.mxu0 %v508_v2  ;;  %vm455_vm2 = vmpackc.low %vm46_vm0, %vm509_vm1  ;;  %457 = vmatprep.subr.bf16.mxu1 %v508_v2  ;;  %v511_v4 = vmov 0.0  }
   0x2   :  { %v454_v3 = vpack.c.bf16 %v40_v1, %v39_v0  ;;  %436 = vmatprep.mubr.msk.f32.mxu0 %vm510_vm3, %v511_v4  ;;  %445 = vmatprep.mubr.msk.f32.mxu1 %vm510_vm3, %v511_v4 }
   0x3   :  { %16 = vsyncpa [#allocation3], 0  ;;  %v41_v5 = vld [vmem:[%s646_s2] sm:$0xff]  ;;  %vm42_vm4 = vcmask 97280   ;;  %vm120_vm5 = vcmask 130048   ;;  %v512_v14 = vmov 0  }
   0x4   :  { %456 = vmatpush3.bf16.msk.msra.mxu0 %vm455_vm2, %v454_v3  ;;  %471 = vset.pattern.permute.xlu1 %v512_v14  ;;  %v133_v18 = vld [vmem:[%s647_s3] sm:$0xff]  ;;  %s513_s25 = smov 16   ;;  %vm151_vm6 = vcmask 1047680   ;;  %vm295_vm7 = vcmask 31744   ;;  %s515_s12 = smov 15   ;;  %vm193_vm8 = vcmask 195584  }
   0x5   :  { %448 = vmatprep.subr.mxu0 %v511_v4  ;;  %477 = vset.pattern.permute.xlu0 %v512_v14  ;;  %v141_v21 = vld [vmem:[%s648_s4] sm:$0xff]  ;;  %s514_s4 = smov 1   ;;  %s516_s13 = smov 14  }
   0x6   :  { %v419_v29 = vld [vmem:[%s645_s1 + $0x2] ss:$0 sm:$0xff]  ;;  %v418_v31 = vld [vmem:[%s645_s1] ss:$0 sm:$0xff] }
   0x7   :  { %437 = vmatmul.mubr.msk.f32.vlgmr.msra.gmra.mrb[0].mxu0 %vm42_vm4, %v41_v5  ;;  %v294_v30 = vld [vmem:[%s652_s8] sm:$0xff]  ;;  %s517_s8 = smov 113  }
   0x8   :  { %449 = vmatpush3.msk.msra.mxu0 %vm46_vm0, %v39_v0  ;;  %450 = vmatprep.mubr.msk.f32.mxu0 %vm510_vm3, %v511_v4  ;;  %v182_v48 = vld [vmem:[%s649_s5] sm:$0xff] }
   0x9   :  { %v384_v2 = vld [vmem:[%s653_s9] sm:$0xff] }
   0xa   :  { %v287_v5 = vld [vmem:[%s651_s7] sm:$0xff]  ;;  %s518_s7 = smov [#allocation2]  }
   0xb   :  { %451 = vmatmul.mubr.msk.f32.vlgmr.msra.gmra.mrb[2].mxu0 %vm295_vm7, %v294_v30  ;;  %s408_s9 = sshll.u32 %s518_s7, 4  ;;  %s409_s9 = int_to_ptr.vmem [resolvable:$true] %s408_s9 }
   0xc   :  { %p489_p1 = scmp.lt.s32.totalorder %s409_s9, %s409_s9 }
  0xda   :  { %v116_v6 = vpop.f32.mrb[0].mxu0 }
  0xdb   :  { %v438_v7 = vpop.f32.mrb[1].mxu0  ;;  %v121_v8 = vsel %vm120_vm5, %v116_v6, 0.0 }
  0xdc   :  { %122 = vadd.xlane.f32.xlu0 %v121_v8 }
  0xde   :  { %v368_v40 = vpop.f32.mrb[2].mxu0 }
  0xdf   :  { %v452_v41 = vpop.f32.mrb[3].mxu0  ;;  %v372_v47 = vsel %vm120_vm5, %v368_v40, 0.0 }
 0x169   :  { %v123_v9 = vpop.xlane.xlu0 %122 }
 0x16a   :  { %v124_v10 = vmul.f32 0.0625, %v123_v9 }
 0x16c   :  { %v125_v11 = vsub.f32 %v116_v6, %v124_v10  ;;  %v392_v6 = vld [vmem:[%s654_s10] sm:$0xff]  ;;  %s484_s10 = scalar_lea.vmem %s409_s9, 128 }
 0x16d   :  { %v279_v10 = vld [vmem:[%s650_s6] sm:$0xff]  ;;  %p485_p0 = scmp.ne.s32.totalorder %s409_s9, %s484_s10  ;;  %p490_p2 = scmp.lt.s32.totalorder %s484_s10, %s484_s10 }
 0x16e   :  { %v126_v12 = vmul.f32 %v125_v11, %v125_v11 }
 0x16f   :  { %p491_p3 = por %p490_p2, %p489_p1 }
 0x170   :  { %v127_v13 = vsel %vm120_vm5, %v126_v12, 0.0 }
 0x171   :  { %128 = vadd.xlane.f32.xlu0 %v127_v13  ;;  %p492_p4 = pnand %p491_p3, %p485_p0 }
 0x1fe   :  { %v129_v15 = vpop.xlane.xlu0 %128 }
 0x1ff   :  { %v130_v16 = vmul.f32 0.0625, %v129_v15 }
 0x201   :  { %v131_v17 = vadd.f32 1e-05, %v130_v16 }
 0x203   :  { %478 = vrsqrt.f32 %v131_v17 }
 0x20d   :  { %v479_v19 = vpop.eup %478 }
 0x20e   :  { %v134_v20 = vmul.f32 %v479_v19, %v133_v18 }
 0x210   :  { %137 = vperm.xlu1 %471, %v134_v20  }
 0x214   :  { %144 = vperm.xlu1 %471, %v141_v21  }
 0x28f   :  { %v138_v22 = vpop.permute.xlu1 %137 }
 0x290   :  { %v140_v23 = vmul.f32 %v138_v22, %v125_v11 }
 0x293   :  { %v145_v24 = vpop.permute.xlu1 %144 }
 0x294   :  { %v147_v25 = vadd.f32 %v145_v24, %v140_v23 }
 0x296   :  { %v148_v26 = vmax.f32 %v147_v25, 0.0 }
 0x298   :  { %152 = vrot.lane.b32.xlu0 %v148_v26, %s513_s25 }
 0x30a   :  { %v153_v27 = vpop.permute.xlu0 %152 }
 0x30b   :  { %v154_v28 = vsel %vm151_vm6, %v153_v27, %v148_v26 }
 0x30c   :  { %155 = vrot.lane.b32.xlu1 %v154_v28, %s513_s25 }
 0x310   :  { %172 = vrot.lane.b32.xlu1 %v419_v29, %s514_s4 }
 0x314   :  { %163 = vrot.lane.b32.xlu1 %v418_v31, %s515_s12 }
 0x318   :  { %177 = vrot.lane.b32.xlu1 %v148_v26, %s515_s12 }
 0x37e   :  { %v156_v32 = vpop.permute.xlu1 %155 }
 0x37f   :  { %v157_v33 = vsel %vm151_vm6, %v156_v32, %v148_v26 }
 0x382   :  { %v173_v34 = vpop.permute.xlu1 %172 }
 0x383   :  { %v175_v35 = vmul.f32 %v173_v34, %v157_v33 }
 0x385   :  { %180 = vrot.lane.b32.xlu1 %v175_v35, %s516_s13 }
 0x386   :  { %v164_v36 = vpop.permute.xlu1 %163 }
 0x387   :  { %v166_v37 = vmul.f32 %v164_v36, %v157_v33 }
 0x38a   :  { %v178_v38 = vpop.permute.xlu1 %177 }
 0x38b   :  { %v472_v39 = vpack.i.bf16 %v178_v38, %v166_v37 }
 0x38d   :  { %473 = vrot.lane.b32.xlu1 %v472_v39, %s517_s8 }
 0x3f7   :  { %v181_v42 = vpop.permute.xlu1 %180 }
 0x3f8   :  { %188 = vrot.lane.b32.xlu0 %v181_v42, %s517_s8 }
 0x3ff   :  { %v474_v43 = vpop.permute.xlu1 %473 }
 0x400   :  { %v476_v44 = vunpack.i.h.bf16 %v474_v43  ;;  %v475_v45 = vunpack.i.l.bf16 %v474_v43 }
 0x402   :  { %v458_v46 = vpack.c.bf16 %v476_v44, %v475_v45 }
 0x404   :  { %459 = vmatpush3.bf16.msra.mxu1 %v458_v46 }
 0x405   :  { %443 = vmatprep.subr.mxu1 %v511_v4 }
 0x417   :  { %373 = vadd.xlane.f32.xlu0 %v372_v47 }
 0x46a   :  { %v189_v49 = vpop.permute.xlu0 %188 }
 0x46b   :  { %444 = vmatpush3.msra.mxu1 %v189_v49 }
 0x46c   :  { %446 = vmatmul.mubr.msk.f32.vlgmr.msra.gmra.mrb[0].mxu1 %vm193_vm8, %v182_v48 }
 0x4a4   :  { %v374_v50 = vpop.xlane.xlu0 %373 }
 0x4a5   :  { %v375_v51 = vmul.f32 0.0625, %v374_v50 }
 0x4a7   :  { %v376_v52 = vsub.f32 %v368_v40, %v375_v51 }
 0x4a9   :  { %v377_v56 = vmul.f32 %v376_v52, %v376_v52 }
 0x4ab   :  { %v378_v57 = vsel %vm120_vm5, %v377_v56, 0.0 }
 0x53f   :  { %v263_v53 = vpop.f32.mrb[0].mxu1 }
 0x540   :  { %v447_v54 = vpop.f32.mrb[1].mxu1  ;;  %v267_v55 = vsel %vm120_vm5, %v263_v53, 0.0 }
 0x541   :  { %268 = vadd.xlane.f32.xlu1 %v267_v55 }
 0x545   :  { %379 = vadd.xlane.f32.xlu1 %v378_v57 }
 0x5ce   :  { %v269_v58 = vpop.xlane.xlu1 %268 }
 0x5cf   :  { %v270_v59 = vmul.f32 0.0625, %v269_v58 }
 0x5d1   :  { %v271_v60 = vsub.f32 %v263_v53, %v270_v59 }
 0x5d2   :  { %v380_v61 = vpop.xlane.xlu1 %379 }
 0x5d3   :  { %v381_v62 = vmul.f32 0.0625, %v380_v61  ;;  %v272_v63 = vmul.f32 %v271_v60, %v271_v60 }
 0x5d5   :  { %v382_v0 = vadd.f32 1e-05, %v381_v62  ;;  %v273_v1 = vsel %vm120_vm5, %v272_v63, 0.0 }
 0x5d6   :  { %274 = vadd.xlane.f32.xlu0 %v273_v1 }
 0x5d7   :  { %480 = vrsqrt.f32 %v382_v0 }
 0x5e1   :  { %v481_v3 = vpop.eup %480 }
 0x5e2   :  { %v385_v4 = vmul.f32 %v481_v3, %v384_v2 }
 0x5e4   :  { %388 = vperm.xlu1 %471, %v385_v4  }
 0x5e8   :  { %290 = vperm.xlu1 %471, %v287_v5  }
 0x5ec   :  { %395 = vperm.xlu1 %471, %v392_v6  }
 0x663   :  { %v275_v7 = vpop.xlane.xlu0 %274  ;;  %v389_v13 = vpop.permute.xlu1 %388 }
 0x664   :  { %v276_v8 = vmul.f32 0.0625, %v275_v7  ;;  %v391_v17 = vmul.f32 %v389_v13, %v376_v52 }
 0x666   :  { %v277_v9 = vadd.f32 1e-05, %v276_v8 }
 0x667   :  { %v291_v14 = vpop.permute.xlu1 %290 }
 0x668   :  { %482 = vrsqrt.f32 %v277_v9 }
 0x66b   :  { %v396_v15 = vpop.permute.xlu1 %395 }
 0x66c   :  { %v398_v19 = vadd.f32 %v396_v15, %v391_v17 }
 0x672   :  { %v483_v11 = vpop.eup %482 }
 0x673   :  { %v280_v12 = vmul.f32 %v483_v11, %v279_v10 }
 0x675   :  { %283 = vperm.xlu0 %477, %v280_v12  }
 0x6f4   :  { %v284_v16 = vpop.permute.xlu0 %283 }
 0x6f5   :  { %v286_v18 = vmul.f32 %v284_v16, %v271_v60 }
 0x6f7   :  { %v293_v20 = vadd.f32 %v291_v14, %v286_v18 }
 0x6f9   :  { %v399_v21 = vadd.f32 %v398_v19, %v293_v20 }
 0x6fb   :  { %v400_v22 = vmax.f32 %v399_v21, 0.0 }
 0x6fd   :  { %401 = vst.msk [vmem:[#allocation2] sm:$0xff] %vm120_vm5, %v400_v22 }
 0x6fe   :  { %495 = shalt.err (!%p492_p4)
}
 0x6ff   :  { %s496_s0 = scalar_lea.hbm %s655_s11, 128 }
 0x700   :  { %p497_p5 = scmp.ne.s32.totalorder %s655_s11, %s496_s0  ;;  %p500_p6 = scmp.lt.u32.totalorder %s496_s0, %s655_s11 }
 0x702   :  { %p502_p7 = pnand %p500_p6, %p497_p5 }
 0x704   :  { %505 = shalt.err (!%p502_p7)
}
 0x705   :  { %411 = dma.vmem_to_hbm [thread:$0]  %s409_s9, 128, %s655_s11, [#allocation3]  }
 0x706   :  { %506 = dma.done.wait [#allocation3], 128  }
 0x707   :  { %507 = vsyncadd [#allocation3], 4294967168 }
 0x708   :  { %415 = vsyncpa [#allocation3], 1 }

</bundles_post_ra>
